<compile_context>
chip_gen: v6e
topology: v6e:2x2x1
jax: 0.10.0
libtpu: 0.0.40
codegen_flags: <defaults>
</compile_context>

<pallas_src>
import functools
import math

import jax
import jax.numpy as jnp
from jax import lax
from jax.experimental import pallas as pl
from jax.experimental.pallas import tpu as pltpu


def _layernorm_kernel(x_ref, o_ref, *, eps, inv_dim):
    # x_ref: (tile_rows, dim) tile in VMEM.  Fused single pass over the tile:
    # sum / sum-of-squares -> mean / var -> normalize.  All math in f32.
    x = x_ref[...].astype(jnp.float32)
    s = jnp.sum(x, axis=-1, keepdims=True)
    ssq = jnp.sum(x * x, axis=-1, keepdims=True)
    mean = s * inv_dim
    # Clamp guards the (rare) catastrophic-cancellation case of E[x^2]-mean^2.
    var = jnp.maximum(ssq * inv_dim - mean * mean, 0.0)
    inv = lax.rsqrt(var + eps)
    o_ref[...] = ((x - mean) * inv).astype(o_ref.dtype)


def _round_down(x, m):
    return (x // m) * m


def _sublane_multiple(dtype):
    # Sub-32-bit dtypes pack along sublanes: f32 -> 8, bf16 -> 16, int8/fp8 -> 32.
    itemsize = jnp.dtype(dtype).itemsize
    return 8 * max(1, 4 // itemsize)


def _vmem_capacity_bytes():
    try:
        return int(pltpu.get_tpu_info().vmem_capacity_bytes)
    except Exception:
        # Conservative fallback (v7x per-TensorCore VMEM).
        return 64 * 1024 * 1024


def _choose_tile_rows(rows, dim, dtype):
    """Pick tile_rows sized to the HW VMEM budget; prefer exact divisors of rows."""
    itemsize = jnp.dtype(dtype).itemsize
    mult = _sublane_multiple(dtype)
    vmem_cap = _vmem_capacity_bytes()

    # Pipeline budget: ~half of physical VMEM (64 MiB on v5e/v6e, 32 MiB on v7x).
    budget = vmem_cap // 2
    # Per-row footprint: double-buffered input + output blocks (native dtype)
    # plus ~one f32 row of compute working set.
    per_row = 2 * 2 * dim * itemsize + 4 * dim
    target = max(mult, _round_down(budget // per_row, mult))
    target = min(target, 2048)

    if rows <= target:
        # One block covering all rows (block == full array extent, so the
        # (8,128) divisibility constraint does not apply).
        return rows

    # Keep a few grid steps so DMA pipelining overlaps and v7x can shard the
    # "parallel" rows axis across both TensorCores.
    if rows >= 4 * mult:
        target = min(target, max(mult, _round_down(rows // 4, mult)))

    # Prefer a tile that divides rows exactly -> no masked partial last block.
    t = target
    while t >= mult:
        if rows % t == 0:
            return t
        t -= mult

    # No sublane-aligned exact divisor: rely on Pallas' masked partial last
    # block (out-of-bounds rows are read as padding and their writes dropped;
    # layernorm is row-independent so this is safe).
    return target


def layer_norm_nonparam(x, eps=1e-5, tile_rows=None):
    """Non-parametric LayerNorm over the last axis of x (matches F.layer_norm)."""
    orig_shape = x.shape
    dim = orig_shape[-1]
    rows = int(math.prod(orig_shape[:-1])) if len(orig_shape) > 1 else 1
    x2d = x.reshape(rows, dim)

    if tile_rows is None:
        tile_rows = _choose_tile_rows(rows, dim, x.dtype)
    tile_rows = max(1, min(int(tile_rows), rows))

    grid = (pl.cdiv(rows, tile_rows),)

    itemsize = jnp.dtype(x.dtype).itemsize
    vmem_cap = _vmem_capacity_bytes()
    cost = pl.CostEstimate(
        flops=5 * rows * dim,                      # ~5 VPU ops/element
        transcendentals=rows,                      # one rsqrt per row
        bytes_accessed=2 * rows * dim * itemsize,  # 1 read + 1 write of x
    )

    # TODO(synk): for dim < 128 a lane-folded layout (segmented reduce over a
    # 128-wide lane axis) would recover the masked-store bandwidth; kept simple here.
    out = pl.pallas_call(
        functools.partial(_layernorm_kernel, eps=float(eps), inv_dim=1.0 / dim),
        out_shape=jax.ShapeDtypeStruct((rows, dim), x.dtype),
        grid_spec=pltpu.PrefetchScalarGridSpec(
            num_scalar_prefetch=0,
            grid=grid,
            in_specs=[pl.BlockSpec((tile_rows, dim), lambda i: (i, 0))],
            out_specs=pl.BlockSpec((tile_rows, dim), lambda i: (i, 0)),
        ),
        compiler_params=pltpu.CompilerParams(
            dimension_semantics=("parallel",),
            vmem_limit_bytes=int((vmem_cap * 3) // 4),
        ),
        cost_estimate=cost,
    )(x2d)

    return out.reshape(orig_shape)


def layer_norm_ref(x, eps=1e-5):
    x32 = x.astype(jnp.float32)
    mean = jnp.mean(x32, axis=-1, keepdims=True)
    var = jnp.mean((x32 - mean) ** 2, axis=-1, keepdims=True)
    return ((x32 - mean) / jnp.sqrt(var + eps)).astype(x.dtype)


if __name__ == "__main__":
    key = jax.random.PRNGKey(0)

    # Small shape consistent with the module: (batch=2, seq=8, hidden=32).
    x = jax.random.normal(key, (2, 8, 32), dtype=jnp.float32)
    y = jax.block_until_ready(layer_norm_nonparam(x, eps=1e-5))
    y_ref = layer_norm_ref(x, eps=1e-5)
    assert y.shape == x.shape and y.dtype == x.dtype
    assert jnp.allclose(y, y_ref, atol=1e-5, rtol=1e-5), "mismatch vs reference"

    # Odd leading dims (rows not a multiple of 8) -> single full-extent block path.
    x2 = jax.random.normal(jax.random.PRNGKey(1), (3, 5, 32), dtype=jnp.float32)
    y2 = jax.block_until_ready(layer_norm_nonparam(x2, eps=1e-5))
    assert jnp.allclose(y2, layer_norm_ref(x2, eps=1e-5), atol=1e-5, rtol=1e-5)

    # bf16 input (compute stays in f32 inside the kernel).
    xb = jax.random.normal(jax.random.PRNGKey(2), (2, 8, 32), dtype=jnp.bfloat16)
    yb = jax.block_until_ready(layer_norm_nonparam(xb, eps=1e-5))
    assert yb.dtype == jnp.bfloat16
    assert jnp.allclose(yb.astype(jnp.float32),
                        layer_norm_ref(xb, eps=1e-5).astype(jnp.float32),
                        atol=3e-2, rtol=3e-2)

    # Multi-block grid with an exact-divisor tile (64 rows / 16 per tile).
    x3 = jax.random.normal(jax.random.PRNGKey(3), (4, 16, 128), dtype=jnp.float32)
    y3 = jax.block_until_ready(layer_norm_nonparam(x3, eps=1e-5, tile_rows=16))
    assert jnp.allclose(y3, layer_norm_ref(x3, eps=1e-5), atol=1e-5, rtol=1e-5)

    # Non-divisible grid: 40 rows with 16-row tiles -> masked partial last block.
    x4 = jax.random.normal(jax.random.PRNGKey(4), (5, 8, 128), dtype=jnp.float32)
    y4 = jax.block_until_ready(layer_norm_nonparam(x4, eps=1e-5, tile_rows=16))
    assert jnp.allclose(y4, layer_norm_ref(x4, eps=1e-5), atol=1e-5, rtol=1e-5)

    print("KERNEL_OK")
</pallas_src>

<mosaic_0001>
module attributes {stable_mosaic.version = 11 : i64} {
  func.func @_layernorm_kernel(%arg0: i32, %arg1: memref<16x32xf32, #tpu.memory_space<vmem>>, %arg2: memref<16x32xf32, #tpu.memory_space<vmem>>) attributes {dimension_semantics = [#tpu.dimension_semantics<parallel>], iteration_bounds = array<i64: 1>, scalar_prefetch = 0 : i64, scratch_operands = 0 : i64, tpu.core_type = #tpu.core_type<tc>, window_params = [{transform_indices = @transform_0, window_bounds = array<i64: 16, 32>}, {transform_indices = @transform_1, window_bounds = array<i64: 16, 32>}]} {
    %c0 = arith.constant 0 : index
    %c0_0 = arith.constant 0 : index
    %0 = vector.load %arg1[%c0, %c0_0] : memref<16x32xf32, #tpu.memory_space<vmem>>, vector<16x32xf32>
    %cst = arith.constant dense<0.000000e+00> : vector<16xf32>
    %1 = vector.multi_reduction <add>, %0, %cst [1] : vector<16x32xf32> to vector<16xf32>
    %2 = vector.shape_cast %1 : vector<16xf32> to vector<16x1xf32>
    %3 = arith.mulf %0, %0 : vector<16x32xf32>
    %cst_1 = arith.constant dense<0.000000e+00> : vector<16xf32>
    %4 = vector.multi_reduction <add>, %3, %cst_1 [1] : vector<16x32xf32> to vector<16xf32>
    %5 = vector.shape_cast %4 : vector<16xf32> to vector<16x1xf32>
    %cst_2 = arith.constant 3.125000e-02 : f32
    %6 = vector.broadcast %cst_2 : f32 to vector<16x1xf32>
    %7 = arith.mulf %2, %6 : vector<16x1xf32>
    %cst_3 = arith.constant 3.125000e-02 : f32
    %8 = vector.broadcast %cst_3 : f32 to vector<16x1xf32>
    %9 = arith.mulf %5, %8 : vector<16x1xf32>
    %10 = arith.mulf %7, %7 : vector<16x1xf32>
    %11 = arith.subf %9, %10 : vector<16x1xf32>
    %cst_4 = arith.constant 0.000000e+00 : f32
    %12 = vector.broadcast %cst_4 : f32 to vector<16x1xf32>
    %13 = arith.maximumf %11, %12 : vector<16x1xf32>
    %cst_5 = arith.constant 9.99999974E-6 : f32
    %14 = vector.broadcast %cst_5 : f32 to vector<16x1xf32>
    %15 = arith.addf %13, %14 : vector<16x1xf32>
    %16 = math.rsqrt %15 : vector<16x1xf32>
    %17 = vector.broadcast %7 : vector<16x1xf32> to vector<16x32xf32>
    %18 = arith.subf %0, %17 : vector<16x32xf32>
    %19 = vector.broadcast %16 : vector<16x1xf32> to vector<16x32xf32>
    %20 = arith.mulf %18, %19 : vector<16x32xf32>
    %c0_6 = arith.constant 0 : index
    %c0_7 = arith.constant 0 : index
    %21 = vector.load %arg2[%c0_6, %c0_7] : memref<16x32xf32, #tpu.memory_space<vmem>>, vector<16x32xf32>
    tpu.vector_store %arg2[%c0_6, %c0_7], %20 {strides = array<i32>} : memref<16x32xf32, #tpu.memory_space<vmem>>, vector<16x32xf32>,
    return
  }
  func.func @transform_0(%arg0: i32) -> (i32, i32) {
    %c0_i32 = arith.constant 0 : i32
    %c0_i32_0 = arith.constant 0 : i32
    return %arg0, %c0_i32 : i32, i32
  }
  func.func @transform_1(%arg0: i32) -> (i32, i32) {
    %c0_i32 = arith.constant 0 : i32
    %c0_i32_0 = arith.constant 0 : i32
    return %arg0, %c0_i32 : i32, i32
  }
}

</mosaic_0001>

<bundles_post_ra>
// kernel: tpu_custom_call.1
= control target key start
LH: loop header
LB: loop body
LE: loop exit
PB: predicated region body
PF: predicated region fallthrough
CT: control target
= control target key end

     0   :  { %6 = vsyncpa [#allocation3], 0  ;;  %s161_s0 = inlined_call_operand.hbm [shape: f32[16,32], index: 0, kind: input, shape index: {}]   ;;  %s162_s1 = inlined_call_operand.hbm [shape: f32[16,32], index: 1, kind: output, shape index: {}]  }
   0x1   :  { %7 = vsyncpa [#allocation4], 0  ;;  %s129_s6 = smov [#allocation2]  }
   0x2   :  { %s13_s7 = sshll.u32 %s129_s6, 4  ;;  %s14_s7 = int_to_ptr.vmem [resolvable:$true] %s13_s7 }
   0x3   :  { %s93_s8 = scalar_lea.vmem %s14_s7, 256  ;;  %p98_p1 = scmp.lt.s32.totalorder %s14_s7, %s14_s7 }
   0x4   :  { %p94_p0 = scmp.ne.s32.totalorder %s14_s7, %s93_s8  ;;  %p99_p2 = scmp.lt.s32.totalorder %s93_s8, %s93_s8 }
   0x6   :  { %p100_p3 = por %p99_p2, %p98_p1 }
   0x8   :  { %p101_p4 = pnand %p100_p3, %p94_p0 }
   0xa   :  { %104 = shalt.err (!%p101_p4)
}
   0xb   :  { %s130_s9 = smov 128   ;;  %s131_s10 = smov 8  }
   0xc   :  { %19 = dma.hbm_to_vmem [thread:$0]  %s161_s0, 256, %s14_s7, [#allocation3], %s130_s9, %s130_s9, %s131_s10  }
   0xd   :  { %125 = dma.done.wait [#allocation3], 256  }
   0xe   :  { %126 = vsyncadd [#allocation3], 4294967040  ;;  %vm25_vm0 = vcmask 261120   ;;  %v23_v0 = vld [vmem:[#allocation2] sm:$0xff]  ;;  %v24_v1 = vld [vmem:[#allocation2 + $0x8] sm:$0xff]  ;;  %s132_s0 = smov [#allocation5]  }
   0xf   :  { %v26_v2 = vsel %vm25_vm0, %v23_v0, 0.0  ;;  %v32_v3 = vmul.f32 %v23_v0, %v23_v0  ;;  %v33_v4 = vmul.f32 %v24_v1, %v24_v1  ;;  %v29_v6 = vsel %vm25_vm0, %v24_v1, 0.0  ;;  %s65_s13 = sshll.u32 %s132_s0, 4  ;;  %s66_s13 = int_to_ptr.vmem [resolvable:$true] %s65_s13 }
  0x10   :  { %27 = vadd.xlane.f32.xlu0 %v26_v2  ;;  %s105_s14 = scalar_lea.vmem %s66_s13, 256  ;;  %p110_p6 = scmp.lt.s32.totalorder %s66_s13, %s66_s13 }
  0x11   :  { %v34_v5 = vsel %vm25_vm0, %v32_v3, 0.0  ;;  %v37_v7 = vsel %vm25_vm0, %v33_v4, 0.0  ;;  %p106_p5 = scmp.ne.s32.totalorder %s66_s13, %s105_s14  ;;  %p111_p7 = scmp.lt.s32.totalorder %s105_s14, %s105_s14 }
  0x12   :  { %35 = vadd.xlane.f32.xlu1 %v34_v5 }
  0x13   :  { %p112_p8 = por %p111_p7, %p110_p6 }
  0x14   :  { %30 = vadd.xlane.f32.xlu0 %v29_v6 }
  0x15   :  { %p113_p9 = pnand %p112_p8, %p106_p5 }
  0x16   :  { %38 = vadd.xlane.f32.xlu1 %v37_v7 }
  0x99   :  { %v28_v8 = vpop.xlane.xlu0 %27 }
  0x9a   :  { %v40_v9 = vmul.f32 0.03125, %v28_v8 }
  0x9b   :  { %v36_v10 = vpop.xlane.xlu1 %35 }
  0x9c   :  { %v44_v11 = vmul.f32 %v40_v9, %v40_v9  ;;  %v42_v12 = vmul.f32 0.03125, %v36_v10  ;;  %v54_v24 = vsub.f32 %v23_v0, %v40_v9 }
  0x9d   :  { %v31_v13 = vpop.xlane.xlu0 %30 }
  0x9e   :  { %v46_v14 = vsub.f32 %v42_v12, %v44_v11  ;;  %v41_v15 = vmul.f32 0.03125, %v31_v13 }
  0x9f   :  { %v39_v16 = vpop.xlane.xlu1 %38 }
  0xa0   :  { %v48_v17 = vmax.f32 %v46_v14, 0.0  ;;  %v45_v18 = vmul.f32 %v41_v15, %v41_v15  ;;  %v43_v19 = vmul.f32 0.03125, %v39_v16  ;;  %v55_v27 = vsub.f32 %v24_v1, %v41_v15 }
  0xa2   :  { %v50_v20 = vadd.f32 1e-05, %v48_v17  ;;  %v47_v21 = vsub.f32 %v43_v19, %v45_v18 }
  0xa4   :  { %81 = vrsqrt.f32 %v50_v20  ;;  %v49_v22 = vmax.f32 %v47_v21, 0.0 }
  0xa6   :  { %v51_v23 = vadd.f32 1e-05, %v49_v22 }
  0xa8   :  { %83 = vrsqrt.f32 %v51_v23 }
  0xb1   :  { %v82_v25 = vpop.eup %81 }
  0xb2   :  { %v56_v26 = vmul.f32 %v82_v25, %v54_v24 }
  0xb4   :  { %58 = vst.msk [vmem:[#allocation5] sm:$0xff] %vm25_vm0, %v56_v26 }
  0xb5   :  { %v84_v28 = vpop.eup %83 }
  0xb6   :  { %v57_v29 = vmul.f32 %v84_v28, %v55_v27 }
  0xb8   :  { %59 = vst.msk [vmem:[#allocation5 + $0x8] sm:$0xff] %vm25_vm0, %v57_v29 }
  0xb9   :  { %116 = shalt.err (!%p113_p9)
}
  0xba   :  { %71 = dma.vmem_to_hbm [thread:$0]  %s66_s13, 256, %s162_s1, [#allocation4], %s130_s9, %s130_s9, %s131_s10  }
  0xbb   :  { %127 = dma.done.wait [#allocation4], 256  }
  0xbc   :  { %128 = vsyncadd [#allocation4], 4294967040 }
  0xbd   :  { %75 = vsyncpa [#allocation3], 1 }
  0xbe   :  { %76 = vsyncpa [#allocation4], 1 }

</bundles_post_ra>
